<compile_context>
chip_gen: v6e
topology: v6e:2x2x1
jax: 0.10.0
libtpu: 0.0.40
codegen_flags: <defaults>
</compile_context>

<pallas_src>
import functools
from dataclasses import dataclass

import jax
import jax.numpy as jnp
from jax.experimental import pallas as pl
from jax.experimental.pallas import tpu as pltpu

TEMPERATURE = 0.07  # pytorch_metric_learning NTXentLoss default


@dataclass
class PretrainingOutput:
    loss: jax.Array


def _round_up(x: int, m: int) -> int:
    return ((x + m - 1) // m) * m


def _ntxent_kernel(inv_t, pad_count, num_k, unroll,
                   xq_ref, xk_ref, labq_ref, laball_ref,   # inputs
                   loss_ref, cnt_ref,                      # outputs (per row block)
                   e_buf, neg_sum):                        # scratch
    q = pl.program_id(0)
    k = pl.program_id(1)
    tq = xq_ref.shape[0]
    tk = xk_ref.shape[0]

    @pl.when(k == 0)
    def _init():
        neg_sum[...] = jnp.zeros_like(neg_sum)
        loss_ref[...] = jnp.zeros_like(loss_ref)
        cnt_ref[...] = jnp.zeros_like(cnt_ref)

    # --- cosine-similarity tile on the MXU (bf16 in, f32 accumulate), no transpose ---
    sim = jax.lax.dot_general(
        xq_ref[...], xk_ref[...],
        dimension_numbers=(((1,), (1,)), ((), ())),
        preferred_element_type=jnp.float32)                     # (tq, tk)
    e = jnp.exp(sim * inv_t)                                    # bounded: |sim| <= ~1
    e_buf[k] = e

    # --- accumulate per-anchor negative exp-sum (single float mask, no iotas) ---
    labq = labq_ref[...]                                        # (tq, 1) int32
    lab_k = laball_ref[k]                                       # (1, tk) int32
    neg_f = (labq != lab_k).astype(jnp.float32)
    neg_sum[...] += jnp.sum(e * neg_f, axis=-1, keepdims=True)  # (tq, 1)

    # --- finalize this row block once all column blocks are accumulated ---
    @pl.when(k == num_k - 1)
    def _finalize():
        # Padded (zero) columns each contributed exp(0)=1 as a "negative";
        # remove them with one static subtraction instead of per-tile masks.
        ns = neg_sum[...] - pad_count                           # (tq, 1) = N_i
        row_g = q * tq + jax.lax.broadcasted_iota(jnp.int32, (tq, tk), 0)
        col_i = jax.lax.broadcasted_iota(jnp.int32, (tq, tk), 1)

        def body(j, carry):
            lsum, csum = carry
            e_j = e_buf[j]                                      # (tq, tk) = exp(l_ij)
            lab_j = laball_ref[j]                               # (1, tk)
            cg = j * tk + col_i
            pos_f = ((labq == lab_j).astype(jnp.float32)
                     * (row_g != cg).astype(jnp.float32))       # i != j
            # log(1 + N_i * exp(-l_ij)); divide via approx EUP reciprocal.
            pair_loss = jnp.log1p(ns * pl.reciprocal(e_j, approx=True))
            return (lsum + jnp.sum(pos_f * pair_loss), csum + jnp.sum(pos_f))

        lsum, csum = jax.lax.fori_loop(
            0, num_k, body, (jnp.float32(0.0), jnp.float32(0.0)), unroll=unroll)
        loss_ref[...] = jnp.broadcast_to(lsum, loss_ref.shape)
        cnt_ref[...] = jnp.broadcast_to(csum, cnt_ref.shape)


def _vmem_limit_bytes(t: int, d: int, num_k: int) -> int:
    f32 = 4
    est = 0
    est += num_k * _round_up(t, 8) * _round_up(t, 128) * f32      # exp row buffer
    est += _round_up(t, 8) * 128 * f32                            # neg_sum scratch
    est += 2 * 2 * _round_up(t, 16) * _round_up(d, 128) * 2       # xq/xk double buffers (bf16)
    est += 2 * _round_up(t, 8) * 128 * f32                        # labq double buffer
    est += num_k * 8 * _round_up(t, 128) * f32                    # label tiles
    est += 2 * 2 * 8 * 128 * f32                                  # partial outputs
    est += 8 * _round_up(t, 8) * _round_up(t, 128) * f32          # tile-sized temporaries
    # Floor at the common default (32 MiB); cap below v7x physical VMEM (64 MiB).
    return int(min(max(est * 3 // 2, 32 << 20), 56 << 20))


def pretraining_head_forward(audio_embeddings, text_embeddings, labels,
                             *, block: int = 256) -> PretrainingOutput:
    """JAX/Pallas equivalent of PretrainingHead.forward."""
    assert audio_embeddings.shape == text_embeddings.shape, \
        'Text and Audio Embeddings do not match dimensions'
    emb = jnp.concatenate([audio_embeddings, text_embeddings], axis=0).astype(jnp.float32)
    lab = jnp.concatenate([labels, labels], axis=0).astype(jnp.int32)
    n, d = emb.shape

    # L2-normalize once in f32 (cheap O(N*D) pre-pass); feed bf16 to the MXU.
    sq = jnp.sum(emb * emb, axis=-1, keepdims=True)
    xn = emb * jax.lax.rsqrt(jnp.maximum(sq, 1e-12))

    # Square (t x t) logits tiles; pad N so both grid axes divide evenly.
    # On v7x (64 MiB VMEM) use a smaller `block` (e.g. 128) for very large N.
    t = min(block, _round_up(n, 8))
    n_pad = _round_up(n, t)
    num_q = n_pad // t
    num_k = n_pad // t
    if n_pad != n:
        xn = jnp.pad(xn, ((0, n_pad - n), (0, 0)))               # zero rows -> sim 0
        # Distinct negative labels: padded rows never form positive pairs.
        lab = jnp.concatenate(
            [lab, -jnp.arange(1, n_pad - n + 1, dtype=jnp.int32)])

    xn_bf = xn.astype(jnp.bfloat16)
    lab_col = lab.reshape(n_pad, 1)
    lab_tiles = lab.reshape(num_k, 1, t)

    kernel = functools.partial(
        _ntxent_kernel, float(1.0 / TEMPERATURE), float(n_pad - n),
        num_k, bool(num_k <= 8))

    loss_parts, cnt_parts = pl.pallas_call(
        kernel,
        grid=(num_q, num_k),
        in_specs=[
            pl.BlockSpec((t, d), lambda q, k: (q, 0)),            # anchor rows
            pl.BlockSpec((t, d), lambda q, k: (k, 0)),            # comparison rows
            pl.BlockSpec((t, 1), lambda q, k: (q, 0)),            # anchor labels (column)
            pl.BlockSpec((num_k, 1, t), lambda q, k: (0, 0, 0)),  # all labels, per col block
        ],
        out_specs=(
            pl.BlockSpec((1, 8, 128), lambda q, k: (q, 0, 0)),
            pl.BlockSpec((1, 8, 128), lambda q, k: (q, 0, 0)),
        ),
        out_shape=(
            jax.ShapeDtypeStruct((num_q, 8, 128), jnp.float32),   # per-row-block loss sum
            jax.ShapeDtypeStruct((num_q, 8, 128), jnp.float32),   # per-row-block pair count
        ),
        scratch_shapes=[
            pltpu.VMEM((num_k, t, t), jnp.float32),               # exp(logits) row buffer
            pltpu.VMEM((t, 1), jnp.float32),                      # per-anchor negative sum
        ],
        compiler_params=pltpu.CompilerParams(
            dimension_semantics=("parallel", "arbitrary"),
            vmem_limit_bytes=_vmem_limit_bytes(t, d, num_k),
        ),
    )(xn_bf, xn_bf, lab_col, lab_tiles)

    total = jnp.sum(loss_parts[:, 0, 0])
    count = jnp.sum(cnt_parts[:, 0, 0])
    loss = jnp.where(count > 0.0, total / jnp.maximum(count, 1.0), 0.0)
    return PretrainingOutput(loss=loss)


def _ntxent_reference(emb, lab, temperature=TEMPERATURE):
    """Pure-JAX NTXentLoss reference for validation."""
    x = emb / jnp.maximum(jnp.linalg.norm(emb, axis=-1, keepdims=True), 1e-6)
    logits = (x @ x.T) / temperature
    n = emb.shape[0]
    same = lab[:, None] == lab[None, :]
    pos = same & ~jnp.eye(n, dtype=bool)
    neg_sum = jnp.sum(jnp.where(~same, jnp.exp(logits), 0.0), axis=-1, keepdims=True)
    pair_loss = jnp.log1p(neg_sum * jnp.exp(-logits))
    total = jnp.sum(jnp.where(pos, pair_loss, 0.0))
    cnt = jnp.sum(pos)
    return jnp.where(cnt > 0, total / cnt, 0.0)


if __name__ == "__main__":
    key = jax.random.PRNGKey(0)
    k_audio, k_text, k_a2, k_t2 = jax.random.split(key, 4)

    # CLIP-style pretraining: audio i and text i form the positive pair.
    B, D = 8, 32
    audio = jax.random.normal(k_audio, (B, D), dtype=jnp.float32)
    text = jax.random.normal(k_text, (B, D), dtype=jnp.float32)
    labels = jnp.arange(B, dtype=jnp.int32)

    out = pretraining_head_forward(audio, text, labels)
    loss = jax.block_until_ready(out.loss)
    ref = _ntxent_reference(jnp.concatenate([audio, text], 0),
                            jnp.concatenate([labels, labels], 0))
    assert loss.shape == () and bool(jnp.isfinite(loss))
    assert abs(float(loss) - float(ref)) <= 0.05 * max(1.0, abs(float(ref))), \
        (float(loss), float(ref))

    # Second case: repeated labels + a batch size that exercises the padding path.
    B2, D2 = 6, 32
    audio2 = jax.random.normal(k_a2, (B2, D2), dtype=jnp.float32)
    text2 = jax.random.normal(k_t2, (B2, D2), dtype=jnp.float32)
    labels2 = jnp.array([0, 0, 1, 1, 2, 2], dtype=jnp.int32)
    out2 = pretraining_head_forward(audio2, text2, labels2)
    loss2 = jax.block_until_ready(out2.loss)
    ref2 = _ntxent_reference(jnp.concatenate([audio2, text2], 0),
                             jnp.concatenate([labels2, labels2], 0))
    assert bool(jnp.isfinite(loss2))
    assert abs(float(loss2) - float(ref2)) <= 0.05 * max(1.0, abs(float(ref2))), \
        (float(loss2), float(ref2))

    print("KERNEL_OK")
</pallas_src>

<mosaic_0001>
module attributes {stable_mosaic.version = 11 : i64} {
  func.func @_ntxent_kernel(%arg0: i32, %arg1: i32, %arg2: memref<16x32xbf16, #tpu.memory_space<vmem>>, %arg3: memref<16x32xbf16, #tpu.memory_space<vmem>>, %arg4: memref<16x1xi32, #tpu.memory_space<vmem>>, %arg5: memref<1x1x16xi32, #tpu.memory_space<vmem>>, %arg6: memref<1x8x128xf32, #tpu.memory_space<vmem>>, %arg7: memref<1x8x128xf32, #tpu.memory_space<vmem>>, %arg8: memref<1x16x16xf32, #tpu.memory_space<vmem>>, %arg9: memref<16x1xf32, #tpu.memory_space<vmem>>) attributes {dimension_semantics = [#tpu.dimension_semantics<parallel>, #tpu.dimension_semantics<arbitrary>], iteration_bounds = array<i64: 1, 1>, scalar_prefetch = 0 : i64, scratch_operands = 2 : i64, tpu.core_type = #tpu.core_type<tc>, window_params = [{transform_indices = @transform_0, window_bounds = array<i64: 16, 32>}, {transform_indices = @transform_1, window_bounds = array<i64: 16, 32>}, {transform_indices = @transform_2, window_bounds = array<i64: 16, 1>}, {pipeline_mode = #tpu.pipeline_mode<synchronous>, transform_indices = @transform_3, window_bounds = array<i64: 1, 1, 16>}, {transform_indices = @transform_4, window_bounds = array<i64: 1, 8, 128>}, {transform_indices = @transform_5, window_bounds = array<i64: 1, 8, 128>}]} {
    %c0_i32 = arith.constant 0 : i32
    %0 = arith.cmpi eq, %arg1, %c0_i32 : i32
    %1 = arith.extui %0 : i1 to i32
    %c0_i32_0 = arith.constant 0 : i32
    %2 = arith.cmpi ne, %1, %c0_i32_0 : i32
    scf.if %2 {
      %cst_18 = arith.constant 0.000000e+00 : f32
      %31 = vector.broadcast %cst_18 : f32 to vector<16x1xf32>
      %c0_19 = arith.constant 0 : index
      %c0_20 = arith.constant 0 : index
      %32 = vector.load %arg9[%c0_19, %c0_20] : memref<16x1xf32, #tpu.memory_space<vmem>>, vector<16x1xf32>
      tpu.vector_store %arg9[%c0_19, %c0_20], %31 {strides = array<i32>} : memref<16x1xf32, #tpu.memory_space<vmem>>, vector<16x1xf32>,
      %cst_21 = arith.constant 0.000000e+00 : f32
      %33 = vector.broadcast %cst_21 : f32 to vector<1x8x128xf32>
      %c0_22 = arith.constant 0 : index
      %c0_23 = arith.constant 0 : index
      %c0_24 = arith.constant 0 : index
      %34 = vector.load %arg6[%c0_22, %c0_23, %c0_24] : memref<1x8x128xf32, #tpu.memory_space<vmem>>, vector<1x8x128xf32>
      tpu.vector_store %arg6[%c0_22, %c0_23, %c0_24], %33 {strides = array<i32>} : memref<1x8x128xf32, #tpu.memory_space<vmem>>, vector<1x8x128xf32>,
      %cst_25 = arith.constant 0.000000e+00 : f32
      %35 = vector.broadcast %cst_25 : f32 to vector<1x8x128xf32>
      %c0_26 = arith.constant 0 : index
      %c0_27 = arith.constant 0 : index
      %c0_28 = arith.constant 0 : index
      %36 = vector.load %arg7[%c0_26, %c0_27, %c0_28] : memref<1x8x128xf32, #tpu.memory_space<vmem>>, vector<1x8x128xf32>
      tpu.vector_store %arg7[%c0_26, %c0_27, %c0_28], %35 {strides = array<i32>} : memref<1x8x128xf32, #tpu.memory_space<vmem>>, vector<1x8x128xf32>,
    } else {
    }
    %c0 = arith.constant 0 : index
    %c0_1 = arith.constant 0 : index
    %3 = vector.load %arg2[%c0, %c0_1] : memref<16x32xbf16, #tpu.memory_space<vmem>>, vector<16x32xbf16>
    %c0_2 = arith.constant 0 : index
    %c0_3 = arith.constant 0 : index
    %4 = vector.load %arg3[%c0_2, %c0_3] : memref<16x32xbf16, #tpu.memory_space<vmem>>, vector<16x32xbf16>
    %cst = arith.constant dense<0.000000e+00> : vector<16x16xf32>
    %5 = tpu.matmul %3, %4, %cst {dimension_numbers = #tpu.dot_dimension_numbers<[1], [1], [0], [0], [0, 0, 1, 0], [], []>} : vector<16x32xbf16>, vector<16x32xbf16>, vector<16x16xf32> -> vector<16x16xf32>
    %cst_4 = arith.constant 14.2857141 : f32
    %6 = vector.broadcast %cst_4 : f32 to vector<16x16xf32>
    %7 = arith.mulf %5, %6 : vector<16x16xf32>
    %8 = math.exp %7 : vector<16x16xf32>
    %9 = arith.index_cast %arg1 : i32 to index
    %c0_5 = arith.constant 0 : index
    %c0_6 = arith.constant 0 : index
    %10 = vector.load %arg8[%9, %c0_5, %c0_6] : memref<1x16x16xf32, #tpu.memory_space<vmem>>, vector<1x16x16xf32>
    %11 = vector.shape_cast %10 : vector<1x16x16xf32> to vector<16x16xf32>
    %12 = vector.shape_cast %8 : vector<16x16xf32> to vector<1x16x16xf32>
    tpu.vector_store %arg8[%9, %c0_5, %c0_6], %12 {strides = array<i32>} : memref<1x16x16xf32, #tpu.memory_space<vmem>>, vector<1x16x16xf32>,
    %c0_7 = arith.constant 0 : index
    %c0_8 = arith.constant 0 : index
    %13 = vector.load %arg4[%c0_7, %c0_8] : memref<16x1xi32, #tpu.memory_space<vmem>>, vector<16x1xi32>
    %14 = arith.index_cast %arg1 : i32 to index
    %c0_9 = arith.constant 0 : index
    %c0_10 = arith.constant 0 : index
    %15 = vector.load %arg5[%14, %c0_9, %c0_10] : memref<1x1x16xi32, #tpu.memory_space<vmem>>, vector<1x1x16xi32>
    %16 = vector.shape_cast %15 : vector<1x1x16xi32> to vector<1x16xi32>
    %17 = vector.broadcast %13 : vector<16x1xi32> to vector<16x16xi32>
    %18 = vector.broadcast %16 : vector<1x16xi32> to vector<16x16xi32>
    %19 = arith.cmpi ne, %17, %18 : vector<16x16xi32>
    %20 = arith.extui %19 : vector<16x16xi1> to vector<16x16xi32>
    %21 = arith.sitofp %20 : vector<16x16xi32> to vector<16x16xf32>
    %c0_11 = arith.constant 0 : index
    %c0_12 = arith.constant 0 : index
    %22 = vector.load %arg9[%c0_11, %c0_12] : memref<16x1xf32, #tpu.memory_space<vmem>>, vector<16x1xf32>
    %23 = arith.mulf %8, %21 : vector<16x16xf32>
    %cst_13 = arith.constant dense<0.000000e+00> : vector<16xf32>
    %24 = vector.multi_reduction <add>, %23, %cst_13 [1] : vector<16x16xf32> to vector<16xf32>
    %25 = vector.shape_cast %24 : vector<16xf32> to vector<16x1xf32>
    %26 = arith.addf %22, %25 : vector<16x1xf32>
    %c0_14 = arith.constant 0 : index
    %c0_15 = arith.constant 0 : index
    %27 = vector.load %arg9[%c0_14, %c0_15] : memref<16x1xf32, #tpu.memory_space<vmem>>, vector<16x1xf32>
    tpu.vector_store %arg9[%c0_14, %c0_15], %26 {strides = array<i32>} : memref<16x1xf32, #tpu.memory_space<vmem>>, vector<16x1xf32>,
    %c0_i32_16 = arith.constant 0 : i32
    %28 = arith.cmpi eq, %arg1, %c0_i32_16 : i32
    %29 = arith.extui %28 : i1 to i32
    %c0_i32_17 = arith.constant 0 : i32
    %30 = arith.cmpi ne, %29, %c0_i32_17 : i32
    scf.if %30 {
      %c0_18 = arith.constant 0 : index
      %c0_19 = arith.constant 0 : index
      %31 = vector.load %arg9[%c0_18, %c0_19] : memref<16x1xf32, #tpu.memory_space<vmem>>, vector<16x1xf32>
      %cst_20 = arith.constant 0.000000e+00 : f32
      %32 = vector.broadcast %cst_20 : f32 to vector<16x1xf32>
      %33 = arith.subf %31, %32 : vector<16x1xf32>
      %c16_i32 = arith.constant 16 : i32
      %34 = arith.muli %arg0, %c16_i32 : i32
      %35 = tpu.iota {dimensions = array<i32: 0>} : vector<16x16xi32>
      %36 = vector.broadcast %34 : i32 to vector<16x16xi32>
      %37 = arith.addi %36, %35 : vector<16x16xi32>
      %38 = tpu.iota {dimensions = array<i32: 1>} : vector<16x16xi32>
      %cst_21 = arith.constant 0.000000e+00 : f32
      %cst_22 = arith.constant 0.000000e+00 : f32
      %c0_i32_23 = arith.constant 0 : i32
      %39 = arith.index_cast %c0_i32_23 : i32 to index
      %c0_24 = arith.constant 0 : index
      %c0_25 = arith.constant 0 : index
      %40 = vector.load %arg8[%39, %c0_24, %c0_25] : memref<1x16x16xf32, #tpu.memory_space<vmem>>, vector<1x16x16xf32>
      %41 = vector.shape_cast %40 : vector<1x16x16xf32> to vector<16x16xf32>
      %42 = arith.index_cast %c0_i32_23 : i32 to index
      %c0_26 = arith.constant 0 : index
      %c0_27 = arith.constant 0 : index
      %43 = vector.load %arg5[%42, %c0_26, %c0_27] : memref<1x1x16xi32, #tpu.memory_space<vmem>>, vector<1x1x16xi32>
      %44 = vector.shape_cast %43 : vector<1x1x16xi32> to vector<1x16xi32>
      %c16_i32_28 = arith.constant 16 : i32
      %45 = arith.muli %c0_i32_23, %c16_i32_28 : i32
      %46 = vector.broadcast %45 : i32 to vector<16x16xi32>
      %47 = arith.addi %46, %38 : vector<16x16xi32>
      %48 = vector.broadcast %13 : vector<16x1xi32> to vector<16x16xi32>
      %49 = vector.broadcast %44 : vector<1x16xi32> to vector<16x16xi32>
      %50 = arith.cmpi eq, %48, %49 : vector<16x16xi32>
      %51 = arith.extui %50 : vector<16x16xi1> to vector<16x16xi32>
      %52 = arith.sitofp %51 : vector<16x16xi32> to vector<16x16xf32>
      %53 = arith.cmpi ne, %37, %47 : vector<16x16xi32>
      %54 = arith.extui %53 : vector<16x16xi1> to vector<16x16xi32>
      %55 = arith.sitofp %54 : vector<16x16xi32> to vector<16x16xf32>
      %56 = arith.mulf %52, %55 : vector<16x16xf32>
      %57 = tpu.reciprocal %41 {approx = true} : vector<16x16xf32> -> vector<16x16xf32>
      %58 = vector.broadcast %33 : vector<16x1xf32> to vector<16x16xf32>
      %59 = arith.mulf %58, %57 : vector<16x16xf32>
      %60 = math.log1p %59 : vector<16x16xf32>
      %61 = arith.mulf %56, %60 : vector<16x16xf32>
      %62 = vector.shape_cast %61 : vector<16x16xf32> to vector<1x16x16xf32>
      %cst_29 = arith.constant dense<0.000000e+00> : vector<1xf32>
      %63 = vector.multi_reduction <add>, %62, %cst_29 [1, 2] : vector<1x16x16xf32> to vector<1xf32>
      %64 = vector.shape_cast %63 : vector<1xf32> to vector<1x1x1xf32>
      %65 = vector.extract %64[0, 0, 0] : f32 from vector<1x1x1xf32>
      %66 = arith.addf %cst_21, %65 : f32
      %67 = vector.shape_cast %56 : vector<16x16xf32> to vector<1x16x16xf32>
      %cst_30 = arith.constant dense<0.000000e+00> : vector<1xf32>
      %68 = vector.multi_reduction <add>, %67, %cst_30 [1, 2] : vector<1x16x16xf32> to vector<1xf32>
      %69 = vector.shape_cast %68 : vector<1xf32> to vector<1x1x1xf32>
      %70 = vector.extract %69[0, 0, 0] : f32 from vector<1x1x1xf32>
      %71 = arith.addf %cst_22, %70 : f32
      %c1_i32 = arith.constant 1 : i32
      %72 = vector.broadcast %66 : f32 to vector<1x8x128xf32>
      %c0_31 = arith.constant 0 : index
      %c0_32 = arith.constant 0 : index
      %c0_33 = arith.constant 0 : index
      %73 = vector.load %arg6[%c0_31, %c0_32, %c0_33] : memref<1x8x128xf32, #tpu.memory_space<vmem>>, vector<1x8x128xf32>
      tpu.vector_store %arg6[%c0_31, %c0_32, %c0_33], %72 {strides = array<i32>} : memref<1x8x128xf32, #tpu.memory_space<vmem>>, vector<1x8x128xf32>,
      %74 = vector.broadcast %71 : f32 to vector<1x8x128xf32>
      %c0_34 = arith.constant 0 : index
      %c0_35 = arith.constant 0 : index
      %c0_36 = arith.constant 0 : index
      %75 = vector.load %arg7[%c0_34, %c0_35, %c0_36] : memref<1x8x128xf32, #tpu.memory_space<vmem>>, vector<1x8x128xf32>
      tpu.vector_store %arg7[%c0_34, %c0_35, %c0_36], %74 {strides = array<i32>} : memref<1x8x128xf32, #tpu.memory_space<vmem>>, vector<1x8x128xf32>,
    } else {
    }
    return
  }
  func.func @transform_0(%arg0: i32, %arg1: i32) -> (i32, i32) {
    %c0_i32 = arith.constant 0 : i32
    %c0_i32_0 = arith.constant 0 : i32
    return %arg0, %c0_i32 : i32, i32
  }
  func.func @transform_1(%arg0: i32, %arg1: i32) -> (i32, i32) {
    %c0_i32 = arith.constant 0 : i32
    %c0_i32_0 = arith.constant 0 : i32
    return %arg1, %c0_i32 : i32, i32
  }
  func.func @transform_2(%arg0: i32, %arg1: i32) -> (i32, i32) {
    %c0_i32 = arith.constant 0 : i32
    %c0_i32_0 = arith.constant 0 : i32
    return %arg0, %c0_i32 : i32, i32
  }
  func.func @transform_3(%arg0: i32, %arg1: i32) -> (i32, i32, i32) {
    %c0_i32 = arith.constant 0 : i32
    %c0_i32_0 = arith.constant 0 : i32
    %c0_i32_1 = arith.constant 0 : i32
    %c0_i32_2 = arith.constant 0 : i32
    return %c0_i32, %c0_i32_0, %c0_i32_1 : i32, i32, i32
  }
  func.func @transform_4(%arg0: i32, %arg1: i32) -> (i32, i32, i32) {
    %c0_i32 = arith.constant 0 : i32
    %c0_i32_0 = arith.constant 0 : i32
    %c0_i32_1 = arith.constant 0 : i32
    return %arg0, %c0_i32, %c0_i32_0 : i32, i32, i32
  }
  func.func @transform_5(%arg0: i32, %arg1: i32) -> (i32, i32, i32) {
    %c0_i32 = arith.constant 0 : i32
    %c0_i32_0 = arith.constant 0 : i32
    %c0_i32_1 = arith.constant 0 : i32
    return %arg0, %c0_i32, %c0_i32_0 : i32, i32, i32
  }
}

</mosaic_0001>

<bundles_post_ra>
// kernel: tpu_custom_call.1
= control target key start
LH: loop header
LB: loop body
LE: loop exit
PB: predicated region body
PF: predicated region fallthrough
CT: control target
= control target key end

     0   :  { %11 = vsyncpa [#allocation5], 0  ;;  %v353_v1 = vmov 0.0   ;;  %vm45_vm0 = vcmask 261120   ;;  %vm354_vm1 = vmmov 0   ;;  %v355_v4 = vmov 0   ;;  %s428_s0 = inlined_call_operand.vmem [shape: bf16[16,32], index: 0, kind: input, shape index: {}]   ;;  %s429_s1 = inlined_call_operand.vmem [shape: bf16[16,32], index: 1, kind: input, shape index: {}]   ;;  %s430_s2 = inlined_call_operand.vmem [shape: s32[16,1], index: 2, kind: input, shape index: {}]   ;;  %s431_s3 = inlined_call_operand.vmem [shape: s32[1,1,16], index: 3, kind: input, shape index: {}]   ;;  %s432_s4 = inlined_call_operand.hbm [shape: f32[1,8,128], index: 4, kind: output, shape index: {0}]   ;;  %s433_s5 = inlined_call_operand.hbm [shape: f32[1,8,128], index: 5, kind: output, shape index: {1}]  }
   0x1   :  { %v295_v0 = vld [vmem:[%s429_s1] sm:$0xff]   ;;  %278 = vmatprep.subr.bf16.mxu0 %v353_v1  ;;  %280 = vmatprep.mubr.msk.bf16.mxu0 %vm354_vm1, %v353_v1 }
   0x2   :  { %v50_v2 = vsel %vm45_vm0, %v295_v0, 0  ;;  %v104_v3 = vld [vmem:[%s430_s2] sm:$0xff]  ;;  %293 = vset.pattern.permute.xlu0 %v355_v4 }
   0x3   :  { %279 = vmatpush3.bf16.xpose.msra.mxu0 %v50_v2 }
   0x4   :  { %12 = vsyncpa [#allocation7], 0  ;;  %108 = vperm.xlu0 %293, %v104_v3   ;;  %294 = vset.pattern.permute.xlu1 %v355_v4  ;;  %v105_v5 = vld [vmem:[%s430_s2 + $0x8] sm:$0xff]  ;;  %v296_v6 = vld [vmem:[%s428_s0] sm:$0xff]   ;;  %vm101_vm4 = vcmask 130048   ;;  %vm26_vm6 = vcmask 7168   ;;  %v144_v34 = vlaneseq }
   0x5   :  { %v268_v7 = vld [vmem:[%s431_s3] ss:$0 sm:$0xff]  ;;  %27 = vst.msk [vmem:[#allocation3] sm:$0xff] %vm26_vm6, %v353_v1  ;;  %28 = vst.msk [vmem:[#allocation3 + $0x8] sm:$0xff] %vm26_vm6, %v353_v1  ;;  %s356_s0 = smov [#allocation4]   ;;  %s357_s3 = smov [#allocation6]  }
   0x6   :  { %v145_v35 = vshrl.u32 %v144_v34, 7  ;;  %v151_v36 = vand.u32 127, %v144_v34  ;;  %s243_s2 = sshll.u32 %s356_s0, 4  ;;  %s253_s27 = sshll.u32 %s357_s3, 4  ;;  %s244_s2 = int_to_ptr.vmem [resolvable:$true] %s243_s2  ;;  %s254_s27 = int_to_ptr.vmem [resolvable:$true] %s253_s27 }
   0x7   :  { %s309_s30 = scalar_lea.vmem %s244_s2, 128  ;;  %p314_p1 = scmp.lt.s32.totalorder %s244_s2, %s244_s2 }
   0x8   :  { %111 = vperm.xlu0 %293, %v105_v5   ;;  %v146_v37 = vadd.s32 8, %v145_v35  ;;  %vm165_vm7 = vcmp.ne.s32.totalorder %v145_v35, %v151_v36  ;;  %p310_p0 = scmp.ne.s32.totalorder %s244_s2, %s309_s30  ;;  %p315_p2 = scmp.lt.s32.totalorder %s309_s30, %s309_s30 }
   0x9   :  { %v274_v39 = vsel %vm165_vm7, 1.0, %v353_v1 }
   0xa   :  { %281 = vmatmul.mubr.msk.bf16.vlgmr.msra.gmra.mxu0 %vm45_vm0, %v296_v6  ;;  %vm166_vm8 = vcmp.ne.s32.totalorder %v146_v37, %v151_v36  ;;  %p316_p3 = por %p315_p2, %p314_p1 }
   0xb   :  { %v275_v41 = vsel %vm166_vm8, 1.0, %v353_v1 }
   0xc   :  { %v123_v26 = vld [vmem:[#allocation3] sm:$0xff]  ;;  %v124_v29 = vld [vmem:[#allocation3 + $0x8] sm:$0xff]  ;;  %p317_p4 = pnand %p316_p3, %p310_p0 }
  0x7f   :  { %v109_v8 = vpop.permute.xlu0 %108 }
  0x80   :  { %vm159_vm2 = vcmp.eq.s32.totalorder %v109_v8, %v268_v7  ;;  %vm117_vm3 = vcmp.ne.s32.totalorder %v109_v8, %v268_v7 }
  0x81   :  { %v269_v18 = vsel %vm117_vm3, 1.0, %v353_v1  ;;  %v272_v38 = vsel %vm159_vm2, 1.0, %v353_v1 }
  0x82   :  { %v171_v42 = vmul.f32 %v274_v39, %v272_v38 }
  0x83   :  { %v112_v17 = vpop.permute.xlu0 %111 }
  0x84   :  { %vm118_vm5 = vcmp.ne.s32.totalorder %v112_v17, %v268_v7  ;;  %vm160_vm9 = vcmp.eq.s32.totalorder %v112_v17, %v268_v7  ;;  %v220_v44 = vsel %vm101_vm4, %v171_v42, 0.0 }
  0x85   :  { %v270_v23 = vsel %vm118_vm5, 1.0, %v353_v1  ;;  %v273_v40 = vsel %vm160_vm9, 1.0, %v353_v1 }
  0x86   :  { %v172_v43 = vmul.f32 %v275_v41, %v273_v40 }
  0x88   :  { %v221_v45 = vsel %vm101_vm4, %v172_v43, 0.0 }
  0x89   :  { %v222_v46 = vadd.f32 %v221_v45, %v220_v44 }
  0xca   :  { %v86_v9 = vpop.f32.mrf.mxu0 }
  0xcb   :  { %v93_v10 = vmul.f32 14.285714, %v86_v9 }
  0xcc   :  { %v282_v11 = vpop.f32.mrf.mxu0 }
  0xcd   :  { %v95_v12 = vmul.f32 1.442695, %v93_v10 }
  0xce   :  { %v89_v13 = vpop.f32.mrf.mxu0 }
  0xcf   :  { %297 = vpow2.f32 %v95_v12  ;;  %v94_v14 = vmul.f32 14.285714, %v89_v13 }
  0xd0   :  { %v283_v15 = vpop.f32.mrf.mxu0 }
  0xd1   :  { %v97_v16 = vmul.f32 1.442695, %v94_v14 }
  0xd3   :  { %299 = vpow2.f32 %v97_v16 }
  0xdc   :  { %v298_v19 = vpop.eup %297 }
  0xdd   :  { %102 = vst.msk [vmem:[#allocation2] sm:$0xff] %vm101_vm4, %v298_v19  ;;  %v125_v20 = vmul.f32 %v298_v19, %v269_v18 }
  0xdf   :  { %v127_v21 = vsel %vm101_vm4, %v125_v20, 0.0 }
  0xe0   :  { %v300_v22 = vpop.eup %299  ;;  %128 = vadd.xlane.f32.xlu1 %v127_v21 }
  0xe1   :  { %103 = vst.msk [vmem:[#allocation2 + $0x8] sm:$0xff] %vm101_vm4, %v300_v22  ;;  %v126_v24 = vmul.f32 %v300_v22, %v270_v23 }
  0xe3   :  { %v130_v25 = vsel %vm101_vm4, %v126_v24, 0.0 }
  0xe4   :  { %131 = vadd.xlane.f32.xlu1 %v130_v25  ;;  %v152_v47 = vld [vmem:[#allocation2] sm:$0xff] }
  0xe5   :  { %301 = vrcp.f32 %v152_v47 }
  0xe8   :  { %v153_v48 = vld [vmem:[#allocation2 + $0x8] sm:$0xff] }
  0xe9   :  { %303 = vrcp.f32 %v153_v48 }
  0xf2   :  { %v302_v49 = vpop.eup %301 }
  0xf6   :  { %v304_v53 = vpop.eup %303 }
 0x169   :  { %v129_v27 = vpop.xlane.xlu1 %128 }
 0x16a   :  { %v133_v28 = vadd.f32 %v129_v27, %v123_v26 }
 0x16c   :  { %136 = vst.msk [vmem:[#allocation3] sm:$0xff] %vm26_vm6, %v133_v28 }
 0x16d   :  { %v132_v30 = vpop.xlane.xlu1 %131 }
 0x16e   :  { %v134_v31 = vadd.f32 %v132_v30, %v124_v29 }
 0x170   :  { %137 = vst.msk [vmem:[#allocation3 + $0x8] sm:$0xff] %vm26_vm6, %v134_v31 }
 0x173   :  { %v141_v32 = vld [vmem:[#allocation3] sm:$0xff] }
 0x174   :  { %177 = vperm.xlu0 %293, %v141_v32  }
 0x177   :  { %v142_v33 = vld [vmem:[#allocation3 + $0x8] sm:$0xff] }
 0x178   :  { %182 = vperm.xlu1 %294, %v142_v33  }
 0x19c   :  { %223 = vadd.xlane.f32.xlu1 %v222_v46 }
 0x1ef   :  { %v178_v50 = vpop.permute.xlu0 %177 }
 0x1f0   :  { %v185_v51 = vmul.f32 %v302_v49, %v178_v50 }
 0x1f2   :  { %v187_v52 = vadd.f32 1.0, %v185_v51  ;;  %v190_v57 = vmul.f32 -0.5, %v185_v51  ;;  %v193_v60 = vand.u32 2147483647, %v185_v51 }
 0x1f3   :  { %v183_v54 = vpop.permute.xlu1 %182 }
 0x1f4   :  { %305 = vlog2.f32 %v187_v52  ;;  %v186_v55 = vmul.f32 %v304_v53, %v183_v54  ;;  %v191_v58 = vadd.f32 1.0, %v190_v57  ;;  %vm194_vm10 = vcmp.lt.f32.partialorder %v193_v60, 0.0004427343 }
 0x1f6   :  { %v196_v56 = vadd.f32 1.0, %v186_v55  ;;  %v199_v59 = vmul.f32 -0.5, %v186_v55  ;;  %v192_v62 = vmul.f32 %v191_v58, %v185_v51  ;;  %v202_v1 = vand.u32 2147483647, %v186_v55 }
 0x1f8   :  { %307 = vlog2.f32 %v196_v56  ;;  %v200_v63 = vadd.f32 1.0, %v199_v59  ;;  %vm203_vm11 = vcmp.lt.f32.partialorder %v202_v1, 0.0004427343 }
 0x1fa   :  { %v201_v4 = vmul.f32 %v200_v63, %v186_v55 }
 0x201   :  { %v306_v61 = vpop.eup %305 }
 0x202   :  { %v189_v0 = vmul.f32 0.6931472, %v306_v61 }
 0x204   :  { %v195_v2 = vsel %vm194_vm10, %v192_v62, %v189_v0 }
 0x205   :  { %v308_v3 = vpop.eup %307  ;;  %v205_v6 = vmul.f32 %v195_v2, %v171_v42 }
 0x206   :  { %v198_v5 = vmul.f32 0.6931472, %v308_v3 }
 0x207   :  { %v207_v9 = vsel %vm101_vm4, %v205_v6, 0.0 }
 0x208   :  { %v204_v7 = vsel %vm203_vm11, %v201_v4, %v198_v5 }
 0x209   :  { %v206_v8 = vmul.f32 %v204_v7, %v172_v43 }
 0x20b   :  { %v208_v10 = vsel %vm101_vm4, %v206_v8, 0.0 }
 0x20c   :  { %v209_v11 = vadd.f32 %v208_v10, %v207_v9 }
 0x20e   :  { %210 = vadd.xlane.f32.xlu0 %v209_v11 }
 0x225   :  { %v224_v12 = vpop.xlane.xlu1 %223 }
 0x226   :  { %v225_v13 = vrot.slane %v224_v12, 4 }
 0x228   :  { %v226_v14 = vadd.f32 %v225_v13, %v224_v12 }
 0x22a   :  { %v227_v15 = vrot.slane %v226_v14, 2 }
 0x22c   :  { %v228_v19 = vadd.f32 %v227_v15, %v226_v14 }
 0x22e   :  { %v229_v22 = vrot.slane %v228_v19, 1 }
 0x230   :  { %v230_v25 = vadd.f32 %v229_v22, %v228_v19 }
 0x297   :  { %v211_v16 = vpop.xlane.xlu0 %210 }
 0x298   :  { %v212_v17 = vrot.slane %v211_v16, 4 }
 0x29a   :  { %v213_v18 = vadd.f32 %v212_v17, %v211_v16 }
 0x29c   :  { %v214_v20 = vrot.slane %v213_v18, 2 }
 0x29e   :  { %v215_v21 = vadd.f32 %v214_v20, %v213_v18 }
 0x2a0   :  { %v216_v23 = vrot.slane %v215_v21, 1 }
 0x2a2   :  { %v217_v24 = vadd.f32 %v216_v23, %v215_v21 }
 0x2a4   :  { %284 = vpush %v217_v24 }
 0x2a5   :  { %286 = vpush %v230_v25 }
 0x2d5   :  { %s285_s28 = spop %284 }
 0x2d6   :  { %v233_v26 = vstv %s285_s28  ;;  %s287_s29 = spop %286 }
 0x2d7   :  { %234 = vst [vmem:[#allocation4] sm:$0xff] %v233_v26  ;;  %v235_v27 = vstv %s287_s29 }
 0x2d8   :  { %236 = vst [vmem:[#allocation6] sm:$0xff] %v235_v27 }
 0x2d9   :  { %320 = shalt.err (!%p317_p4)
}
 0x2da   :  { %246 = dma.vmem_to_hbm [thread:$0]  %s244_s2, 128, %s432_s4, [#allocation5]  }
 0x2db   :  { %s329_s8 = scalar_lea.vmem %s254_s27, 128  ;;  %p334_p6 = scmp.lt.s32.totalorder %s254_s27, %s254_s27 }
 0x2dc   :  { %p330_p5 = scmp.ne.s32.totalorder %s254_s27, %s329_s8  ;;  %p335_p7 = scmp.lt.s32.totalorder %s329_s8, %s329_s8 }
 0x2de   :  { %p336_p8 = por %p335_p7, %p334_p6 }
 0x2e0   :  { %p337_p9 = pnand %p336_p8, %p330_p5 }
 0x2e2   :  { %340 = shalt.err (!%p337_p9)
}
 0x2e3   :  { %256 = dma.vmem_to_hbm [thread:$0]  %s254_s27, 128, %s433_s5, [#allocation7]  }
 0x2e4   :  { %349 = dma.done.wait [#allocation5], 128  }
 0x2e5   :  { %350 = vsyncadd [#allocation5], 4294967168 }
 0x2e6   :  { %351 = dma.done.wait [#allocation7], 128  }
 0x2e7   :  { %352 = vsyncadd [#allocation7], 4294967168 }
 0x2e8   :  { %263 = vsyncpa [#allocation5], 1 }
 0x2e9   :  { %264 = vsyncpa [#allocation7], 1 }

</bundles_post_ra>
